<compile_context>
chip_gen: v5e
topology: v5e:2x2
jax: 0.10.0
libtpu: 0.0.40
codegen_flags: <defaults>
</compile_context>

<pallas_src>
import jax
import jax.numpy as jnp
from jax.experimental import pallas as pl
from jax.experimental.pallas import tpu as pltpu


def _linear_add_kernel(x_ref, w_ref, bpo_ref, o_ref):
    # x_ref:  (8, TM)  VMEM slab (feature axis on sublanes, rows on lanes)
    # w_ref:  (8, 1)   VMEM weight column, resident across grid steps
    # bpo_ref:(1,)     SMEM scalar = bias + other (pre-folded in the wrapper)
    # o_ref:  (1, TM)  lane-dense output slab
    prod = x_ref[...] * w_ref[...]              # VPU: broadcast weights along lanes
    y = jnp.sum(prod, axis=0, keepdims=True)    # XLU sublane reduce -> (1, TM)
    o_ref[...] = (y + bpo_ref[0]).astype(o_ref.dtype)


def linear_plus_other(x, weight, bias, other, *, tm=1024):
    """x: (..., 8) f32; weight: (1, 8); bias: (1,); other: python/np scalar."""
    in_features = weight.shape[1]
    lead_shape = x.shape[:-1]
    x2d = x.reshape(-1, in_features)            # (M, 8)
    M = x2d.shape[0]

    # Lane-dense layout: (8, M) with rows on the 128-wide lane axis.
    x_t = x2d.T                                 # (8, M)

    # Pad M to a multiple of 128 lanes; tile at TM columns (<= tm, mult of 128).
    M_pad = max(pl.cdiv(M, 128) * 128, 128)
    TM = min(tm, M_pad)
    M_pad = pl.cdiv(M_pad, TM) * TM
    if M_pad != M:
        x_t = jnp.pad(x_t, ((0, 0), (0, M_pad - M)))

    w_col = weight.T.astype(jnp.float32)        # (8, 1)
    bpo = (bias.astype(jnp.float32) + jnp.float32(other)).reshape(1)  # fold bias+other

    out = pl.pallas_call(
        _linear_add_kernel,
        out_shape=jax.ShapeDtypeStruct((1, M_pad), jnp.float32),
        grid=(M_pad // TM,),
        in_specs=[
            pl.BlockSpec((in_features, TM), lambda i: (0, i)),
            pl.BlockSpec((in_features, 1), lambda i: (0, 0)),   # resident weights
            pl.BlockSpec(memory_space=pltpu.MemorySpace.SMEM),  # bias+other scalar
        ],
        out_specs=pl.BlockSpec((1, TM), lambda i: (0, i)),
        compiler_params=pltpu.CompilerParams(
            dimension_semantics=("parallel",)),
    )(x_t, w_col, bpo)

    return out[0, :M].reshape(*lead_shape, 1)


if __name__ == "__main__":
    key = jax.random.PRNGKey(0)
    kx, kw, kb = jax.random.split(key, 3)

    # Small shapes consistent with the forward: last dim == in_features == 8.
    x1 = jax.random.normal(kx, (2, 4, 16, 8), dtype=jnp.float32)

    # Deterministic nn.Linear(8, 1) parameters (synthetic init).
    weight = jax.random.normal(kw, (1, 8), dtype=jnp.float32) * 0.1
    bias = jax.random.normal(kb, (1,), dtype=jnp.float32) * 0.1
    other = 1.5  # the `other` constant passed to Model(__init__)

    out = linear_plus_other(x1, weight, bias, other)
    out = jax.block_until_ready(out)

    # Reference check (plain JAX)
    ref = x1 @ weight.T + bias + other
    assert out.shape == (2, 4, 16, 1)
    assert jnp.allclose(out, ref, atol=1e-5, rtol=1e-5)

    print("KERNEL_OK")
</pallas_src>

<mosaic_0001>
module attributes {stable_mosaic.version = 11 : i64} {
  func.func @_linear_add_kernel(%arg0: i32, %arg1: memref<8x128xf32, #tpu.memory_space<vmem>>, %arg2: memref<8x1xf32, #tpu.memory_space<vmem>>, %arg3: memref<1xf32, #tpu.memory_space<smem>>, %arg4: memref<1x128xf32, #tpu.memory_space<vmem>>) attributes {dimension_semantics = [#tpu.dimension_semantics<parallel>], iteration_bounds = array<i64: 1>, scalar_prefetch = 0 : i64, scratch_operands = 0 : i64, tpu.core_type = #tpu.core_type<tc>, window_params = [{transform_indices = @transform_0, window_bounds = array<i64: 8, 128>}, {pipeline_mode = #tpu.pipeline_mode<synchronous>, transform_indices = @transform_1, window_bounds = array<i64: 8, 1>}, {transform_indices = @transform_2, window_bounds = array<i64: 1>}, {transform_indices = @transform_3, window_bounds = array<i64: 1, 128>}]} {
    %c0 = arith.constant 0 : index
    %c0_0 = arith.constant 0 : index
    %0 = vector.load %arg1[%c0, %c0_0] : memref<8x128xf32, #tpu.memory_space<vmem>>, vector<8x128xf32>
    %c0_1 = arith.constant 0 : index
    %c0_2 = arith.constant 0 : index
    %1 = vector.load %arg2[%c0_1, %c0_2] : memref<8x1xf32, #tpu.memory_space<vmem>>, vector<8x1xf32>
    %2 = vector.broadcast %1 : vector<8x1xf32> to vector<8x128xf32>
    %3 = arith.mulf %0, %2 : vector<8x128xf32>
    %cst = arith.constant dense<0.000000e+00> : vector<128xf32>
    %4 = vector.multi_reduction <add>, %3, %cst [0] : vector<8x128xf32> to vector<128xf32>
    %5 = vector.shape_cast %4 : vector<128xf32> to vector<1x128xf32>
    %c0_3 = arith.constant 0 : index
    %6 = memref.load %arg3[%c0_3] : memref<1xf32, #tpu.memory_space<smem>>
    %7 = vector.broadcast %6 : f32 to vector<1x128xf32>
    %8 = arith.addf %5, %7 : vector<1x128xf32>
    %c0_4 = arith.constant 0 : index
    %c0_5 = arith.constant 0 : index
    %9 = vector.load %arg4[%c0_4, %c0_5] : memref<1x128xf32, #tpu.memory_space<vmem>>, vector<1x128xf32>
    tpu.vector_store %arg4[%c0_4, %c0_5], %8 {strides = array<i32>} : memref<1x128xf32, #tpu.memory_space<vmem>>, vector<1x128xf32>,
    return
  }
  func.func @transform_0(%arg0: i32) -> (i32, i32) {
    %c0_i32 = arith.constant 0 : i32
    %c0_i32_0 = arith.constant 0 : i32
    return %c0_i32, %arg0 : i32, i32
  }
  func.func @transform_1(%arg0: i32) -> (i32, i32) {
    %c0_i32 = arith.constant 0 : i32
    %c0_i32_0 = arith.constant 0 : i32
    %c0_i32_1 = arith.constant 0 : i32
    return %c0_i32, %c0_i32_0 : i32, i32
  }
  func.func @transform_2(%arg0: i32) -> i32 {
    %c0_i32 = arith.constant 0 : i32
    %c0_i32_0 = arith.constant 0 : i32
    return %c0_i32 : i32
  }
  func.func @transform_3(%arg0: i32) -> (i32, i32) {
    %c0_i32 = arith.constant 0 : i32
    %c0_i32_0 = arith.constant 0 : i32
    return %c0_i32, %arg0 : i32, i32
  }
}

</mosaic_0001>

<bundles_post_ra>
// kernel: tpu_custom_call.1
= control target key start
LH: loop header
LB: loop body
LE: loop exit
PB: predicated region body
PF: predicated region fallthrough
CT: control target
= control target key end

     0   :  { %s113_s0 = inlined_call_operand.vmem [shape: f32[8,128], index: 0, kind: input, shape index: {}]   ;;  %s114_s1 = inlined_call_operand.vmem [shape: f32[8,1], index: 1, kind: input, shape index: {}]   ;;  %s115_s2 = inlined_call_operand.<no memory space> [shape: f32[1], index: 2, kind: input, shape index: {}]   ;;  %s116_s3 = inlined_call_operand.hbm [shape: f32[1,128], index: 3, kind: output, shape index: {}]  }
   0x1   :  { %v17_v0 = vld [vmem:[%s114_s1] sm:$0xff] }
   0x2   :  { %9 = vsyncpa [#allocation4], 0  ;;  %v79_v1 = vmov 0   ;;  %v16_v2 = vld [vmem:[%s113_s0] sm:$0xff]  ;;  %v31_v10 = vstv %s115_s2  ;;  %s80_s1 = smov [#allocation3]   ;;  %s41_s21 = sshll.u32 %s116_s3, 4  ;;  %s42_s21 = int_to_ptr.hbm [resolvable:$true] %s41_s21 }
   0x3   :  { %52 = vset.pattern.permute.xlu0 %v79_v1  ;;  %s39_s18 = sshll.u32 %s80_s1, 4  ;;  %s40_s18 = int_to_ptr.vmem [resolvable:$true] %s39_s18 }
   0x4   :  { %20 = vperm.xlu0 %52, %v17_v0  }
  0x76   :  { %v21_v3 = vpop.permute.xlu0 %20 }
  0x77   :  { %v23_v4 = vmul.f32 %v21_v3, %v16_v2 }
  0x79   :  { %v24_v5 = vrot.slane %v23_v4, 4 }
  0x7b   :  { %v25_v6 = vadd.f32 %v24_v5, %v23_v4 }
  0x7d   :  { %v26_v7 = vrot.slane %v25_v6, 2 }
  0x7f   :  { %v27_v8 = vadd.f32 %v26_v7, %v25_v6 }
  0x81   :  { %v28_v9 = vrot.slane %v27_v8, 1 }
  0x83   :  { %v29_v11 = vadd.f32 %v28_v9, %v27_v8 }
  0x85   :  { %v32_v12 = vadd.f32 %v31_v10, %v29_v11 }
  0x87   :  { %33 = vst [vmem:[#allocation3] sm:$0x1] %v32_v12 }
  0x88   :  { %44 = dma.vmem_to_hbm [thread:$0]  %s40_s18, 16, %s42_s21, [#allocation4]  }
  0x89   :  { %77 = dma.done.wait [#allocation4], 16  }
  0x8a   :  { %78 = vsyncadd [#allocation4], 4294967280 }
  0x8b   :  { %49 = vsyncpa [#allocation4], 1 }

</bundles_post_ra>
